<compile_context>
chip_gen: v7x
topology: tpu7x:2x2x1
jax: 0.10.0
libtpu: 0.0.40
codegen_flags: <defaults>
</compile_context>

<pallas_src>
import jax
import jax.numpy as jnp
from jax import lax
from jax.experimental import pallas as pl
from jax.experimental.pallas import tpu as pltpu


def _round_up(a, m):
    return (a + m - 1) // m * m


def _cdiv(a, b):
    return -(-a // b)


def _make_kernel(num_layers, is_BN, is_normalized, norm_order, feat_dims,
                 matmul_dtype, norm_eps=1e-12):
    """Kernel closure over the static module configuration.

    refs: (x_ref, vec_ref, w_0 .. w_{L-1}, out_ref[, out_norm_ref])
      x_ref    : [tile_b, f0]            input dtype (cast to f32 in kernel)
      vec_ref  : [n_vec, F_pad]          f32  (BN scale/shift + biases)
      w_l      : [p_l, p_{l+1}]          matmul_dtype (hidden dims 128-padded)
      out_*    : [tile_b, out_dim]       f32
    """

    def kernel(x_ref, vec_ref, *rest):
        w_refs = rest[:num_layers]
        out_refs = rest[num_layers:]

        h = x_ref[...].astype(jnp.float32)

        row = 0
        if is_BN:
            # Folded eval-mode BatchNorm1d + ReLU  (F.relu(self.bn(x)))
            scale = vec_ref[0:1, : feat_dims[0]]
            shift = vec_ref[1:2, : feat_dims[0]]
            row = 2
            h = jnp.maximum(h * scale + shift, 0.0)

        # MLP: Linear (+ReLU except after the last layer)
        for l in range(num_layers):
            bias = vec_ref[row + l: row + l + 1, : feat_dims[l + 1]]
            h = jnp.dot(h.astype(matmul_dtype), w_refs[l][...],
                        preferred_element_type=jnp.float32) + bias
            if l < num_layers - 1:
                h = jnp.maximum(h, 0.0)

        out_refs[0][...] = h.astype(out_refs[0].dtype)

        if is_normalized:
            if norm_order == 2:
                inv_nrm = lax.rsqrt(
                    jnp.maximum(jnp.sum(h * h, axis=-1, keepdims=True),
                                norm_eps * norm_eps))
            elif norm_order == 1:
                inv_nrm = pl.reciprocal(
                    jnp.maximum(jnp.sum(jnp.abs(h), axis=-1, keepdims=True),
                                norm_eps))
            else:
                inv_nrm = jnp.power(
                    jnp.maximum(jnp.sum(jnp.abs(h) ** norm_order, axis=-1,
                                        keepdims=True),
                                norm_eps ** norm_order),
                    -1.0 / norm_order)
            out_refs[1][...] = (h * inv_nrm).astype(out_refs[1].dtype)

    return kernel


def hyperspherical_forward(x, params, *, channels, is_BN, is_normalized,
                           norm_order, block_b=None,
                           matmul_dtype=jnp.bfloat16, bn_eps=1e-5,
                           out_dtype=jnp.float32):
    """HypersphericalModule forward pass as a single batch-tiled Pallas kernel.

    x: [b, channels[0]]
    params: dict with optional 'bn' = (gamma, beta, running_mean, running_var)
            and 'mlp' = list of (W [f_in, f_out], bias [f_out]).
    Returns [x_out] or [x_out, x_out_normalized], each [b, channels[-1]].
    """
    b, f0 = x.shape
    assert f0 == channels[0], "input feature dim must match channels[0]"
    num_layers = len(channels) - 1
    out_dim = channels[-1]
    n_out = 2 if is_normalized else 1

    # Hidden dims padded to 128 lanes (vreg-dense intermediates); IO dims untouched.
    padded = [channels[0]] + [_round_up(c, 128) for c in channels[1:-1]] + [channels[-1]]

    # ---- pack the small per-feature vectors into one 128-lane-padded slab ----
    F_pad = _round_up(max(padded), 128)

    def _row(v):
        v = jnp.asarray(v, jnp.float32).reshape(-1)
        return jnp.pad(v, (0, F_pad - v.shape[0]))

    rows = []
    if is_BN:
        gamma, beta, rmean, rvar = (jnp.asarray(p, jnp.float32).reshape(-1)
                                    for p in params["bn"])
        scale = gamma * lax.rsqrt(rvar + bn_eps)
        shift = beta - rmean * scale
        rows += [_row(scale), _row(shift)]

    weights = []
    for l, (w, bias) in enumerate(params["mlp"]):
        w = jnp.asarray(w, jnp.float32)
        w = jnp.pad(w, ((0, padded[l] - channels[l]),
                        (0, padded[l + 1] - channels[l + 1])))
        weights.append(w.astype(matmul_dtype))
        rows.append(_row(bias))          # zero-padded -> padded hidden lanes stay 0
    vec_slab = jnp.stack(rows, axis=0)   # [n_vec, F_pad] f32

    # ---- batch tile sizing (largest tile fitting a per-generation-safe budget) ----
    x_row_bytes = f0 * x.dtype.itemsize
    out_row_bytes = n_out * out_dim * jnp.dtype(out_dtype).itemsize
    act_row_bytes = 6 * sum(padded)                      # f32 activations + cast temps (rough)
    per_row = 2 * (x_row_bytes + out_row_bytes) + act_row_bytes

    budget = 24 * (1 << 20)                              # safe on v5e/v6e/v7x with limit bump
    cap = max(8, (budget // per_row) // 8 * 8)
    tile_b = cap if block_b is None else max(8, min(_round_up(block_b, 8), cap))
    tile_b = min(tile_b, _round_up(b, 8))
    # Keep >= 2 grid steps for megacore sharding when the batch is big enough.
    half = _round_up(_cdiv(b, 2), 8)
    if b >= 2048 and tile_b > half:
        tile_b = half
    grid = (_cdiv(b, tile_b),)

    params_bytes = (sum(int(w.size) * w.dtype.itemsize for w in weights)
                    + int(vec_slab.size) * 4)
    est_vmem = tile_b * per_row + 2 * params_bytes
    vmem_limit = int(min(max(est_vmem * 14 // 10, 32 << 20), 48 << 20))

    flops = 2 * b * sum(padded[l] * padded[l + 1] for l in range(num_layers))
    cost = pl.CostEstimate(
        flops=int(flops),
        transcendentals=int(b if is_normalized else 0),
        bytes_accessed=int(b * (x_row_bytes + out_row_bytes) + params_bytes))

    in_specs = [
        pl.BlockSpec((tile_b, f0), lambda i: (i, 0)),        # x: blocked on batch
        pl.BlockSpec(vec_slab.shape, lambda i: (0, 0)),      # param slab: resident
    ]
    in_specs += [pl.BlockSpec(w.shape, lambda i: (0, 0)) for w in weights]

    out_shapes = [jax.ShapeDtypeStruct((b, out_dim), out_dtype) for _ in range(n_out)]
    out_specs = [pl.BlockSpec((tile_b, out_dim), lambda i: (i, 0)) for _ in range(n_out)]
    if n_out == 1:
        out_shapes, out_specs = out_shapes[0], out_specs[0]

    kernel = _make_kernel(num_layers, is_BN, is_normalized, norm_order,
                          tuple(padded), matmul_dtype)

    result = pl.pallas_call(
        kernel,
        out_shape=out_shapes,
        grid_spec=pltpu.PrefetchScalarGridSpec(
            num_scalar_prefetch=0,
            grid=grid,
            in_specs=in_specs,
            out_specs=out_specs,
            scratch_shapes=(),
        ),
        compiler_params=pltpu.CompilerParams(
            dimension_semantics=("parallel",),
            vmem_limit_bytes=vmem_limit),
        cost_estimate=cost,
    )(x, vec_slab, *weights)

    return list(result) if is_normalized else [result]


# -------------------------- pure-JAX reference ------------------------------
def _reference_forward(x, params, *, channels, is_BN, is_normalized, norm_order,
                       bn_eps=1e-5):
    h = x.astype(jnp.float32)
    if is_BN:
        gamma, beta, rmean, rvar = (jnp.asarray(p, jnp.float32).reshape(1, -1)
                                    for p in params["bn"])
        h = (h - rmean) * lax.rsqrt(rvar + bn_eps) * gamma + beta
        h = jnp.maximum(h, 0.0)
    num_layers = len(channels) - 1
    for l, (w, bias) in enumerate(params["mlp"]):
        h = h @ jnp.asarray(w, jnp.float32) + jnp.asarray(bias, jnp.float32).reshape(1, -1)
        if l < num_layers - 1:
            h = jnp.maximum(h, 0.0)
    out = [h]
    if is_normalized:
        nrm = jnp.sum(jnp.abs(h) ** norm_order, axis=-1,
                      keepdims=True) ** (1.0 / norm_order)
        out.append(h / jnp.maximum(nrm, 1e-12))
    return out


def _make_params(key, channels, is_BN):
    keys = jax.random.split(key, 4 + 2 * (len(channels) - 1))
    params = {}
    if is_BN:
        f0 = channels[0]
        gamma = 1.0 + 0.1 * jax.random.normal(keys[0], (f0,), jnp.float32)
        beta = 0.1 * jax.random.normal(keys[1], (f0,), jnp.float32)
        rmean = 0.05 * jax.random.normal(keys[2], (f0,), jnp.float32)
        rvar = 1.0 + 0.1 * jnp.abs(jax.random.normal(keys[3], (f0,), jnp.float32))
        params["bn"] = (gamma, beta, rmean, rvar)
    mlp = []
    k = 4
    for f_in, f_out in zip(channels[:-1], channels[1:]):
        w = jax.random.normal(keys[k], (f_in, f_out), jnp.float32) / jnp.sqrt(f_in)
        bias = 0.01 * jax.random.normal(keys[k + 1], (f_out,), jnp.float32)
        mlp.append((w, bias))
        k += 2
    params["mlp"] = mlp
    return params


def _check(outs, refs, atol, rtol, name):
    assert len(outs) == len(refs), name
    for o, r in zip(outs, refs):
        assert o.shape == r.shape and o.dtype == r.dtype, name
        if not jnp.allclose(o, r, atol=atol, rtol=rtol):
            raise AssertionError(f"{name}: Pallas kernel mismatch vs reference")


if __name__ == "__main__":
    master = jax.random.PRNGKey(0)
    k_a, k_b, k_xa, k_xb = jax.random.split(master, 4)

    # ---- Config A: BN + L2 normalize, f32 MXU (tight tolerance) --------------
    channels_a = [32, 64, 16]
    params_a = _make_params(k_a, channels_a, is_BN=True)
    x_a = jax.random.normal(k_xa, (16, channels_a[0]), jnp.float32)

    outs_a = [jax.block_until_ready(o) for o in hyperspherical_forward(
        x_a, params_a, channels=channels_a, is_BN=True, is_normalized=True,
        norm_order=2, matmul_dtype=jnp.float32)]
    refs_a = _reference_forward(x_a, params_a, channels=channels_a, is_BN=True,
                                is_normalized=True, norm_order=2)
    _check(outs_a, refs_a, 1e-4, 1e-4, "Config A")

    # ---- Config B: no BN, ragged multi-step batch grid, default bf16 MXU -----
    channels_b = [48, 96, 32]
    params_b = _make_params(k_b, channels_b, is_BN=False)
    x_b = jax.random.normal(k_xb, (200, channels_b[0]), jnp.float32)

    outs_b = [jax.block_until_ready(o) for o in hyperspherical_forward(
        x_b, params_b, channels=channels_b, is_BN=False, is_normalized=True,
        norm_order=2, block_b=128)]          # grid=2, last block ragged (200 rows)
    refs_b = _reference_forward(x_b, params_b, channels=channels_b, is_BN=False,
                                is_normalized=True, norm_order=2)
    _check(outs_b, refs_b, 5e-2, 5e-2, "Config B")

    # ---- Config C: no normalization (single output path), f32 ----------------
    outs_c = [jax.block_until_ready(o) for o in hyperspherical_forward(
        x_a, params_a, channels=channels_a, is_BN=True, is_normalized=False,
        norm_order=2, matmul_dtype=jnp.float32)]
    refs_c = _reference_forward(x_a, params_a, channels=channels_a, is_BN=True,
                                is_normalized=False, norm_order=2)
    _check(outs_c, refs_c, 1e-4, 1e-4, "Config C")

    # ---- Config D: p=1 normalization (pl.reciprocal path), f32 ---------------
    outs_d = [jax.block_until_ready(o) for o in hyperspherical_forward(
        x_b, params_b, channels=channels_b, is_BN=False, is_normalized=True,
        norm_order=1, block_b=128, matmul_dtype=jnp.float32)]
    refs_d = _reference_forward(x_b, params_b, channels=channels_b, is_BN=False,
                                is_normalized=True, norm_order=1)
    _check(outs_d, refs_d, 1e-4, 1e-4, "Config D")

    print("KERNEL_OK")
</pallas_src>

<mosaic_0001>
module attributes {stable_mosaic.version = 11 : i64} {
  func.func @kernel(%arg0: i32, %arg1: memref<16x32xf32, #tpu.memory_space<vmem>>, %arg2: memref<4x128xf32, #tpu.memory_space<vmem>>, %arg3: memref<32x128xf32, #tpu.memory_space<vmem>>, %arg4: memref<128x16xf32, #tpu.memory_space<vmem>>, %arg5: memref<16x16xf32, #tpu.memory_space<vmem>>, %arg6: memref<16x16xf32, #tpu.memory_space<vmem>>) attributes {dimension_semantics = [#tpu.dimension_semantics<parallel>], iteration_bounds = array<i64: 1>, scalar_prefetch = 0 : i64, scratch_operands = 0 : i64, tpu.core_type = #tpu.core_type<tc>, window_params = [{transform_indices = @transform_0, window_bounds = array<i64: 16, 32>}, {pipeline_mode = #tpu.pipeline_mode<synchronous>, transform_indices = @transform_1, window_bounds = array<i64: 4, 128>}, {pipeline_mode = #tpu.pipeline_mode<synchronous>, transform_indices = @transform_2, window_bounds = array<i64: 32, 128>}, {pipeline_mode = #tpu.pipeline_mode<synchronous>, transform_indices = @transform_3, window_bounds = array<i64: 128, 16>}, {transform_indices = @transform_4, window_bounds = array<i64: 16, 16>}, {transform_indices = @transform_5, window_bounds = array<i64: 16, 16>}]} {
    %c0 = arith.constant 0 : index
    %c0_0 = arith.constant 0 : index
    %0 = vector.load %arg1[%c0, %c0_0] : memref<16x32xf32, #tpu.memory_space<vmem>>, vector<16x32xf32>
    %c0_1 = arith.constant 0 : index
    %c0_2 = arith.constant 0 : index
    %1 = vector.load %arg2[%c0_1, %c0_2] : memref<4x128xf32, #tpu.memory_space<vmem>>, vector<1x32xf32>
    %c1 = arith.constant 1 : index
    %c0_3 = arith.constant 0 : index
    %2 = vector.load %arg2[%c1, %c0_3] : memref<4x128xf32, #tpu.memory_space<vmem>>, vector<1x32xf32>
    %3 = vector.broadcast %1 : vector<1x32xf32> to vector<16x32xf32>
    %4 = arith.mulf %0, %3 : vector<16x32xf32>
    %5 = vector.broadcast %2 : vector<1x32xf32> to vector<16x32xf32>
    %6 = arith.addf %4, %5 : vector<16x32xf32>
    %cst = arith.constant 0.000000e+00 : f32
    %7 = vector.broadcast %cst : f32 to vector<16x32xf32>
    %8 = arith.maximumf %6, %7 : vector<16x32xf32>
    %c2 = arith.constant 2 : index
    %c0_4 = arith.constant 0 : index
    %9 = vector.load %arg2[%c2, %c0_4] : memref<4x128xf32, #tpu.memory_space<vmem>>, vector<1x128xf32>
    %c0_5 = arith.constant 0 : index
    %c0_6 = arith.constant 0 : index
    %10 = vector.load %arg3[%c0_5, %c0_6] : memref<32x128xf32, #tpu.memory_space<vmem>>, vector<32x128xf32>
    %cst_7 = arith.constant dense<0.000000e+00> : vector<16x128xf32>
    %11 = tpu.matmul %8, %10, %cst_7 {dimension_numbers = #tpu.dot_dimension_numbers<[1], [0], [0], [1], [0, 0, 1, 1], [], []>} : vector<16x32xf32>, vector<32x128xf32>, vector<16x128xf32> -> vector<16x128xf32>
    %12 = vector.broadcast %9 : vector<1x128xf32> to vector<16x128xf32>
    %13 = arith.addf %11, %12 : vector<16x128xf32>
    %cst_8 = arith.constant 0.000000e+00 : f32
    %14 = vector.broadcast %cst_8 : f32 to vector<16x128xf32>
    %15 = arith.maximumf %13, %14 : vector<16x128xf32>
    %c3 = arith.constant 3 : index
    %c0_9 = arith.constant 0 : index
    %16 = vector.load %arg2[%c3, %c0_9] : memref<4x128xf32, #tpu.memory_space<vmem>>, vector<1x16xf32>
    %c0_10 = arith.constant 0 : index
    %c0_11 = arith.constant 0 : index
    %17 = vector.load %arg4[%c0_10, %c0_11] : memref<128x16xf32, #tpu.memory_space<vmem>>, vector<128x16xf32>
    %cst_12 = arith.constant dense<0.000000e+00> : vector<16x16xf32>
    %18 = tpu.matmul %15, %17, %cst_12 {dimension_numbers = #tpu.dot_dimension_numbers<[1], [0], [0], [1], [0, 0, 1, 1], [], []>} : vector<16x128xf32>, vector<128x16xf32>, vector<16x16xf32> -> vector<16x16xf32>
    %19 = vector.broadcast %16 : vector<1x16xf32> to vector<16x16xf32>
    %20 = arith.addf %18, %19 : vector<16x16xf32>
    %c0_13 = arith.constant 0 : index
    %c0_14 = arith.constant 0 : index
    %21 = vector.load %arg5[%c0_13, %c0_14] : memref<16x16xf32, #tpu.memory_space<vmem>>, vector<16x16xf32>
    tpu.vector_store %arg5[%c0_13, %c0_14], %20 {strides = array<i32>} : memref<16x16xf32, #tpu.memory_space<vmem>>, vector<16x16xf32>,
    %22 = arith.mulf %20, %20 : vector<16x16xf32>
    %cst_15 = arith.constant dense<0.000000e+00> : vector<16xf32>
    %23 = vector.multi_reduction <add>, %22, %cst_15 [1] : vector<16x16xf32> to vector<16xf32>
    %24 = vector.shape_cast %23 : vector<16xf32> to vector<16x1xf32>
    %cst_16 = arith.constant 1.000000e-24 : f32
    %25 = vector.broadcast %cst_16 : f32 to vector<16x1xf32>
    %26 = arith.maximumf %24, %25 : vector<16x1xf32>
    %27 = math.rsqrt %26 : vector<16x1xf32>
    %28 = vector.broadcast %27 : vector<16x1xf32> to vector<16x16xf32>
    %29 = arith.mulf %20, %28 : vector<16x16xf32>
    %c0_17 = arith.constant 0 : index
    %c0_18 = arith.constant 0 : index
    %30 = vector.load %arg6[%c0_17, %c0_18] : memref<16x16xf32, #tpu.memory_space<vmem>>, vector<16x16xf32>
    tpu.vector_store %arg6[%c0_17, %c0_18], %29 {strides = array<i32>} : memref<16x16xf32, #tpu.memory_space<vmem>>, vector<16x16xf32>,
    return
  }
  func.func @transform_0(%arg0: i32) -> (i32, i32) {
    %c0_i32 = arith.constant 0 : i32
    %c0_i32_0 = arith.constant 0 : i32
    return %arg0, %c0_i32 : i32, i32
  }
  func.func @transform_1(%arg0: i32) -> (i32, i32) {
    %c0_i32 = arith.constant 0 : i32
    %c0_i32_0 = arith.constant 0 : i32
    %c0_i32_1 = arith.constant 0 : i32
    return %c0_i32, %c0_i32_0 : i32, i32
  }
  func.func @transform_2(%arg0: i32) -> (i32, i32) {
    %c0_i32 = arith.constant 0 : i32
    %c0_i32_0 = arith.constant 0 : i32
    %c0_i32_1 = arith.constant 0 : i32
    return %c0_i32, %c0_i32_0 : i32, i32
  }
  func.func @transform_3(%arg0: i32) -> (i32, i32) {
    %c0_i32 = arith.constant 0 : i32
    %c0_i32_0 = arith.constant 0 : i32
    %c0_i32_1 = arith.constant 0 : i32
    return %c0_i32, %c0_i32_0 : i32, i32
  }
  func.func @transform_4(%arg0: i32) -> (i32, i32) {
    %c0_i32 = arith.constant 0 : i32
    %c0_i32_0 = arith.constant 0 : i32
    return %arg0, %c0_i32 : i32, i32
  }
  func.func @transform_5(%arg0: i32) -> (i32, i32) {
    %c0_i32 = arith.constant 0 : i32
    %c0_i32_0 = arith.constant 0 : i32
    return %arg0, %c0_i32 : i32, i32
  }
}

</mosaic_0001>

<bundles_post_ra>
// kernel: tpu_custom_call.1
= control target key start
LH: loop header
LB: loop body
LE: loop exit
PB: predicated region body
PF: predicated region fallthrough
CT: control target
= control target key end

     0   :  { %11 = vsyncpa [#allocation3], 0  ;;  %vm48_vm0 = vcmask 261120   ;;  %s599_s0 = inlined_call_operand.vmem [shape: f32[16,32], index: 0, kind: input, shape index: {}]   ;;  %s600_s1 = inlined_call_operand.vmem [shape: f32[4,128], index: 1, kind: input, shape index: {}]   ;;  %s601_s2 = inlined_call_operand.vmem [shape: f32[32,128], index: 2, kind: input, shape index: {}]   ;;  %s602_s3 = inlined_call_operand.vmem [shape: f32[128,16], index: 3, kind: input, shape index: {}]   ;;  %s603_s4 = inlined_call_operand.hbm [shape: f32[16,16], index: 4, kind: output, shape index: {0}]   ;;  %s604_s5 = inlined_call_operand.hbm [shape: f32[16,16], index: 5, kind: output, shape index: {1}]  }
   0x1   :  { %v40_v0 = vld [vmem:[%s601_s2] sm:$0xff]  ;;  %v41_v1 = vld [vmem:[%s601_s2 + $0x8] sm:$0xff]  ;;  %v42_v2 = vld [vmem:[%s601_s2 + $0x10] sm:$0xff] }
   0x2   :  { %v355_v3 = vpack.c.bf16 %v41_v1, %v40_v0  ;;  %v43_v4 = vld [vmem:[%s601_s2 + $0x18] sm:$0xff]  ;;  %v21_v5 = vld [vmem:[%s599_s0] sm:$0xff]  ;;  %v22_v6 = vld [vmem:[%s599_s0 + $0x8] sm:$0xff] }
   0x3   :  { %v359_v7 = vpack.c.bf16 %v43_v4, %v42_v2  ;;  %v279_v8 = vld [vmem:[%s600_s1] ss:$0 sm:$0xff]  ;;  %v280_v9 = vld [vmem:[%s600_s1 + $0x1] ss:$0 sm:$0xff]  ;;  %v134_v13 = vld [vmem:[%s602_s3 + $0x8] sm:$0xff] }
   0x4   :  { %v133_v10 = vld [vmem:[%s602_s3] sm:$0xff]  ;;  %356 = vmatprep.subr.bf16.mxu0 %v355_v3  ;;  %v29_v11 = vmul.f32 %v279_v8, %v21_v5  ;;  %v30_v12 = vmul.f32 %v279_v8, %v22_v6  ;;  %v135_v14 = vld [vmem:[%s602_s3 + $0x10] sm:$0xff]  ;;  %v136_v15 = vld [vmem:[%s602_s3 + $0x18] sm:$0xff] }
   0x5   :  { %358 = vmatpush3.bf16.msra.mxu0 %v355_v3  ;;  %v363_v16 = vpack.c.bf16 %v134_v13, %v133_v10  ;;  %v367_v17 = vpack.c.bf16 %v136_v15, %v135_v14  ;;  %v137_v20 = vld [vmem:[%s602_s3 + $0x20] sm:$0xff]  ;;  %v138_v21 = vld [vmem:[%s602_s3 + $0x28] sm:$0xff] }
   0x6   :  { %360 = vmatprep.subr.bf16.mxu0 %v359_v7  ;;  %v35_v18 = vadd.f32 %v280_v9, %v29_v11  ;;  %v36_v19 = vadd.f32 %v280_v9, %v30_v12 }
   0x7   :  { %364 = vmatprep.subr.bf16.mxu1 %v363_v16 }
   0x8   :  { %v37_v22 = vmax.f32 %v35_v18, 0.0  ;;  %v38_v23 = vmax.f32 %v36_v19, 0.0  ;;  %366 = vmatpush3.bf16.msra.mxu1 %v363_v16 }
   0x9   :  { %12 = vsyncpa [#allocation5], 0  ;;  %362 = vmatpush3.bf16.msra.mxu0 %v359_v7  ;;  %368 = vmatprep.subr.bf16.mxu1 %v367_v17  ;;  %v371_v24 = vpack.c.bf16 %v138_v21, %v137_v20  ;;  %v139_v25 = vld [vmem:[%s602_s3 + $0x30] sm:$0xff]  ;;  %v140_v26 = vld [vmem:[%s602_s3 + $0x38] sm:$0xff]  ;;  %vm228_vm1 = vcmask 130048  }
   0xa   :  { %317 = vmatprep.mubr.msk.f32.mxu0 %vm48_vm0, %v37_v22  ;;  %v375_v27 = vpack.c.bf16 %v140_v26, %v139_v25  ;;  %v141_v28 = vld [vmem:[%s602_s3 + $0x40] sm:$0xff]  ;;  %v142_v29 = vld [vmem:[%s602_s3 + $0x48] sm:$0xff]  ;;  %v143_v31 = vld [vmem:[%s602_s3 + $0x50] sm:$0xff] }
   0xb   :  { %v379_v30 = vpack.c.bf16 %v142_v29, %v141_v28  ;;  %v144_v32 = vld [vmem:[%s602_s3 + $0x58] sm:$0xff]  ;;  %v145_v34 = vld [vmem:[%s602_s3 + $0x60] sm:$0xff]  ;;  %v146_v35 = vld [vmem:[%s602_s3 + $0x68] sm:$0xff] }
   0xc   :  { %318 = vmatmul.mubr.msk.f32.vlgmr.msra.gmra.mrb[0].mxu0 %vm48_vm0, %v38_v23  ;;  %370 = vmatpush3.bf16.msra.mxu1 %v367_v17  ;;  %v383_v33 = vpack.c.bf16 %v144_v32, %v143_v31  ;;  %v387_v36 = vpack.c.bf16 %v146_v35, %v145_v34  ;;  %v147_v37 = vld [vmem:[%s602_s3 + $0x70] sm:$0xff]  ;;  %v148_v38 = vld [vmem:[%s602_s3 + $0x78] sm:$0xff]  ;;  %v281_v40 = vld [vmem:[%s600_s1 + $0x2] ss:$0 sm:$0xff]  ;;  %s451_s3 = smov [#allocation2]  }
   0xd   :  { %372 = vmatprep.subr.bf16.mxu1 %v371_v24  ;;  %v391_v39 = vpack.c.bf16 %v148_v38, %v147_v37  ;;  %v284_v47 = vld [vmem:[%s600_s1 + $0x3] ss:$0 sm:$0xff]  ;;  %s252_s16 = sshll.u32 %s451_s3, 4  ;;  %s253_s16 = int_to_ptr.vmem [resolvable:$true] %s252_s16 }
   0xe   :  { %s403_s1 = scalar_lea.vmem %s253_s16, 256  ;;  %p408_p1 = scmp.lt.s32.totalorder %s253_s16, %s253_s16 }
   0xf   :  { %p404_p0 = scmp.ne.s32.totalorder %s253_s16, %s403_s1  ;;  %p409_p2 = scmp.lt.s32.totalorder %s403_s1, %s403_s1 }
  0x10   :  { %374 = vmatpush3.bf16.msra.mxu1 %v371_v24 }
  0x11   :  { %376 = vmatprep.subr.bf16.mxu1 %v375_v27  ;;  %p410_p3 = por %p409_p2, %p408_p1 }
  0x13   :  { %p411_p4 = pnand %p410_p3, %p404_p0 }
  0x14   :  { %378 = vmatpush3.bf16.msra.mxu1 %v375_v27 }
  0x15   :  { %380 = vmatprep.subr.bf16.mxu1 %v379_v30 }
  0x18   :  { %382 = vmatpush3.bf16.msra.mxu1 %v379_v30 }
  0x19   :  { %384 = vmatprep.subr.bf16.mxu1 %v383_v33 }
  0x1c   :  { %386 = vmatpush3.bf16.msra.mxu1 %v383_v33 }
  0x1d   :  { %388 = vmatprep.subr.bf16.mxu1 %v387_v36 }
  0x20   :  { %390 = vmatpush3.bf16.msra.mxu1 %v387_v36 }
  0x21   :  { %392 = vmatprep.subr.bf16.mxu1 %v391_v39 }
  0x24   :  { %394 = vmatpush3.bf16.msra.mxu1 %v391_v39 }
  0xdf   :  { %v319_v41 = vpop.f32.mrb[0].mxu0 }
  0xe0   :  { %v127_v42 = vadd.f32 %v319_v41, %v281_v40  ;;  %v121_v43 = vpop.f32.mrb[1].mxu0 }
  0xe1   :  { %v122_v44 = vadd.f32 %v281_v40, %v121_v43 }
  0xe2   :  { %v131_v46 = vmax.f32 %v127_v42, 0.0 }
  0xe3   :  { %v130_v45 = vmax.f32 %v122_v44, 0.0 }
  0xe5   :  { %352 = vmatprep.mubr.f32.mxu1 %v130_v45 }
  0xe6   :  { %353 = vmatmul.mubr.f32.vlgmr.msra.gmra.mrb[0].mxu1 %v131_v46 }
 0x1b9   :  { %v354_v48 = vpop.f32.mrb[0].mxu1 }
 0x1ba   :  { %v225_v49 = vadd.f32 %v354_v48, %v284_v47  ;;  %v219_v50 = vpop.f32.mrb[1].mxu1 }
 0x1bb   :  { %v220_v51 = vadd.f32 %v284_v47, %v219_v50 }
 0x1bc   :  { %230 = vst.msk [vmem:[#allocation2 + $0x8] sm:$0xff] %vm228_vm1, %v225_v49  ;;  %v232_v54 = vmul.f32 %v225_v49, %v225_v49 }
 0x1bd   :  { %229 = vst.msk [vmem:[#allocation2] sm:$0xff] %vm228_vm1, %v220_v51  ;;  %v231_v52 = vmul.f32 %v220_v51, %v220_v51 }
 0x1be   :  { %v236_v55 = vsel %vm228_vm1, %v232_v54, 0.0 }
 0x1bf   :  { %v233_v53 = vsel %vm228_vm1, %v231_v52, 0.0 }
 0x1c0   :  { %234 = vadd.xlane.f32.xlu0 %v233_v53 }
 0x1c4   :  { %237 = vadd.xlane.f32.xlu0 %v236_v55 }
 0x1c5   :  { %414 = shalt.err (!%p411_p4)
}
 0x1c6   :  { %s415_s19 = scalar_lea.hbm %s603_s4, 256 }
 0x1c7   :  { %p416_p5 = scmp.ne.s32.totalorder %s603_s4, %s415_s19  ;;  %p419_p6 = scmp.lt.u32.totalorder %s415_s19, %s603_s4 }
 0x1c9   :  { %p421_p7 = pnand %p419_p6, %p416_p5 }
 0x1cb   :  { %424 = shalt.err (!%p421_p7)
}
 0x1cc   :  { %s452_s24 = smov 128   ;;  %s453_s25 = smov 8  }
 0x1cd   :  { %258 = dma.vmem_to_hbm [thread:$0]  %s253_s16, 256, %s603_s4, [#allocation3], %s452_s24, %s452_s24, %s453_s25  }
 0x1ce   :  { %s454_s28 = smov [#allocation4]  }
 0x1cf   :  { %s264_s29 = sshll.u32 %s454_s28, 4  ;;  %s265_s29 = int_to_ptr.vmem [resolvable:$true] %s264_s29 }
 0x1d0   :  { %s425_s30 = scalar_lea.vmem %s265_s29, 256  ;;  %p430_p9 = scmp.lt.s32.totalorder %s265_s29, %s265_s29 }
 0x1d1   :  { %p426_p8 = scmp.ne.s32.totalorder %s265_s29, %s425_s30  ;;  %p431_p10 = scmp.lt.s32.totalorder %s425_s30, %s425_s30 }
 0x1d3   :  { %p432_p11 = por %p431_p10, %p430_p9 }
 0x1d5   :  { %p433_p12 = pnand %p432_p11, %p426_p8 }
 0x24d   :  { %v235_v56 = vpop.xlane.xlu0 %234 }
 0x24e   :  { %v239_v57 = vmax.f32 %v235_v56, 1e-24 }
 0x250   :  { %399 = vrsqrt.f32 %v239_v57 }
 0x251   :  { %v238_v58 = vpop.xlane.xlu0 %237 }
 0x252   :  { %v240_v59 = vmax.f32 %v238_v58, 1e-24 }
 0x254   :  { %401 = vrsqrt.f32 %v240_v59 }
 0x25a   :  { %v400_v60 = vpop.eup %399 }
 0x25b   :  { %v243_v61 = vmul.f32 %v400_v60, %v220_v51 }
 0x25d   :  { %245 = vst.msk [vmem:[#allocation4] sm:$0xff] %vm228_vm1, %v243_v61 }
 0x25e   :  { %v402_v62 = vpop.eup %401 }
 0x25f   :  { %v244_v63 = vmul.f32 %v402_v62, %v225_v49 }
 0x261   :  { %246 = vst.msk [vmem:[#allocation4 + $0x8] sm:$0xff] %vm228_vm1, %v244_v63 }
 0x262   :  { %436 = shalt.err (!%p433_p12)
}
 0x263   :  { %s437_s7 = scalar_lea.hbm %s604_s5, 256 }
 0x264   :  { %p438_p13 = scmp.ne.s32.totalorder %s604_s5, %s437_s7  ;;  %p441_p0 = scmp.lt.u32.totalorder %s437_s7, %s604_s5 }
 0x266   :  { %p443_p1 = pnand %p441_p0, %p438_p13 }
 0x268   :  { %446 = shalt.err (!%p443_p1)
}
 0x269   :  { %270 = dma.vmem_to_hbm [thread:$0]  %s265_s29, 256, %s604_s5, [#allocation5], %s452_s24, %s452_s24, %s453_s25  }
 0x26a   :  { %447 = dma.done.wait [#allocation3], 256  }
 0x26b   :  { %448 = vsyncadd [#allocation3], 4294967040 }
 0x26c   :  { %449 = dma.done.wait [#allocation5], 256  }
 0x26d   :  { %450 = vsyncadd [#allocation5], 4294967040 }
 0x26e   :  { %277 = vsyncpa [#allocation3], 1 }
 0x26f   :  { %278 = vsyncpa [#allocation5], 1 }

</bundles_post_ra>
